<compile_context>
chip_gen: v6e
topology: v6e:2x2x1
jax: 0.10.0
libtpu: 0.0.40
codegen_flags: <defaults>
</compile_context>

<pallas_src>
import math
import functools

import jax
import jax.numpy as jnp
from jax.experimental import pallas as pl
from jax.experimental.pallas import tpu as pltpu

_EPS = 1e-5
_INV_SQRT2 = 1.0 / math.sqrt(2.0)


def _detect_vmem_capacity():
    try:
        return int(pltpu.get_tpu_info().vmem_capacity_bytes)
    except Exception:
        return 64 * 1024 * 1024  # conservative fallback: v7x per-TC VMEM


_VMEM_CAP = _detect_vmem_capacity()
_BIG_VMEM = _VMEM_CAP >= 100 * 1024 * 1024          # v5e / v6e (128 MiB VMEM)
_MAX_TILE_UNITS = 8 if _BIG_VMEM else 4             # tk / tn up to 1024 or 512
_MAX_ROWS = 1024 if _BIG_VMEM else 512               # Bb * T rows per block
_K_PANEL_CAP = 2048 if _BIG_VMEM else 1024           # single-K-panel threshold
_VMEM_LIMIT = (96 if _BIG_VMEM else 48) * 1024 * 1024


def _round_up(x, m):
    return (x + m - 1) // m * m


def _pick_tile(dim_padded, unit=128, max_units=4):
    """Largest multiple of `unit` that divides dim_padded and is <= unit*max_units."""
    n_units = dim_padded // unit
    for m in range(min(n_units, max_units), 0, -1):
        if n_units % m == 0:
            return unit * m
    return unit


def _pick_batch_block(B, T, sublane, max_rows):
    """Batch elements per grid step; >1 only when the (Bb,T)->(Bb*T) merge is layout-free."""
    if T % sublane != 0:
        return 1
    cap = max(1, max_rows // T)
    for d in range(min(B, cap), 0, -1):
        if B % d == 0:
            return d
    return 1


def _plan_n(Cout, max_units):
    """Output-channel tiling: (padded N width, tn, pad amount)."""
    if Cout % 128 == 0:
        return Cout, _pick_tile(Cout, 128, max_units), 0
    if Cout <= 128 * max_units:
        # Single full-extent N panel: no pad, no output slice.
        return Cout, Cout, 0
    Cout_p = _round_up(Cout, 128)
    return Cout_p, _pick_tile(Cout_p, 128, max_units), Cout_p - Cout


def _norm_gelu(y, g, be):
    """InstanceNorm1d (stats over axis=1) + affine + exact-erf GELU, all in f32."""
    mean = jnp.mean(y, axis=1, keepdims=True)                       # (Bb, 1, tn)
    var = jnp.mean((y - mean) * (y - mean), axis=1, keepdims=True)  # biased var
    scale = g * jax.lax.rsqrt(var + _EPS)                           # (Bb, 1, tn)
    shift = be - mean * scale
    y_hat = y * scale + shift
    return 0.5 * y_hat * (1.0 + jax.lax.erf(y_hat * _INV_SQRT2))


def _fc_fullk_kernel(x_ref, w_ref, g_ref, be_ref, o_ref):
    # x_ref: (Bb, T, Cin) bf16, w_ref: (Cin, tn) bf16, g/be: (1, tn) f32.
    Bb, T, K = x_ref.shape
    tn = w_ref.shape[1]
    x2 = x_ref[...].reshape(Bb * T, K)  # layout-free: Bb == 1 or T % sublane == 0
    y = jnp.dot(x2, w_ref[...], preferred_element_type=jnp.float32)
    y = y.reshape(Bb, T, tn)
    o_ref[...] = _norm_gelu(y, g_ref[...], be_ref[...]).astype(o_ref.dtype)


def _fc_ktiled_kernel(x_ref, w_ref, g_ref, be_ref, o_ref, acc_ref):
    # x_ref: (Bb, T, tk) bf16, w_ref: (tk, tn) bf16, acc_ref: (Bb*T, tn) f32.
    Bb, T, tk = x_ref.shape
    tn = w_ref.shape[1]
    k = pl.program_id(2)

    x2 = x_ref[...].reshape(Bb * T, tk)
    part = jnp.dot(x2, w_ref[...], preferred_element_type=jnp.float32)

    @pl.when(k == 0)
    def _():
        acc_ref[...] = part          # direct store: no zero-init write + read

    @pl.when(k > 0)
    def _():
        acc_ref[...] += part

    @pl.when(k == pl.num_programs(2) - 1)
    def _():
        y = acc_ref[...].reshape(Bb, T, tn)
        o_ref[...] = _norm_gelu(y, g_ref[...], be_ref[...]).astype(o_ref.dtype)


@functools.partial(jax.jit, static_argnames=("operand_dtype", "k_panel_cap"))
def fc_layer(x, w, b, gamma, beta, *, operand_dtype=jnp.bfloat16, k_panel_cap=None):
    """FCLayer forward.

    x:     (B, T, Cin)
    w:     (Cout, Cin)  torch nn.Linear weight layout
    b:     (Cout,)      accepted for API parity but unused: a bias constant over
                        T is cancelled exactly by InstanceNorm's mean over T.
                        (Only valid while the norm axis is T.)
    gamma: (Cout,), beta: (Cout,)  InstanceNorm1d affine parameters.
    returns (B, T, Cout) in x.dtype.
    """
    del b  # mathematically cancelled by the instance norm's mean subtraction
    B, T, Cin = x.shape
    Cout = w.shape[0]
    if k_panel_cap is None:
        k_panel_cap = _K_PANEL_CAP

    # Output-channel plan (lane-dense tn when possible; single panel otherwise).
    N_total, tn, pad_n = _plan_n(Cout, _MAX_TILE_UNITS)
    n_blocks = N_total // tn

    # Norm affine (f32). gamma pad = 0 => padded channels produce exact zeros.
    g2 = jnp.pad(gamma, (0, pad_n)).reshape(1, N_total).astype(jnp.float32)
    be2 = jnp.pad(beta, (0, pad_n)).reshape(1, N_total).astype(jnp.float32)

    # Batch blocking: merge Bb batch elements into one MXU matmul when the
    # (Bb, T) -> (Bb*T) merge is layout-free for the operand dtype.
    sublane = 16 if jnp.dtype(operand_dtype).itemsize == 2 else 8
    Bb = _pick_batch_block(B, T, sublane, _MAX_ROWS)
    if (not _BIG_VMEM) and B >= 2 and (B // Bb) * n_blocks < 2:
        # v7x has 2 TensorCores: make sure there are >= 2 parallel grid blocks.
        for d in range(B // 2, 0, -1):
            if B % d == 0:
                Bb = d
                break

    out_shape = jax.ShapeDtypeStruct((B, T, N_total), x.dtype)

    if Cin <= k_panel_cap:
        # Single full-K panel: no K grid axis, no accumulator, and no x padding
        # (full-extent last block dim bypasses the 128-divisibility rule).
        x_c = x.astype(operand_dtype)
        w_t = jnp.pad(jnp.transpose(w), ((0, 0), (0, pad_n))).astype(operand_dtype)
        out_p = pl.pallas_call(
            _fc_fullk_kernel,
            out_shape=out_shape,
            grid_spec=pltpu.PrefetchScalarGridSpec(
                num_scalar_prefetch=0,
                grid=(B // Bb, n_blocks),
                in_specs=[
                    pl.BlockSpec((Bb, T, Cin), lambda bi, ni: (bi, 0, 0)),
                    pl.BlockSpec((Cin, tn), lambda bi, ni: (0, ni)),
                    pl.BlockSpec((1, tn), lambda bi, ni: (0, ni)),
                    pl.BlockSpec((1, tn), lambda bi, ni: (0, ni)),
                ],
                out_specs=pl.BlockSpec((Bb, T, tn), lambda bi, ni: (bi, 0, ni)),
            ),
            compiler_params=pltpu.CompilerParams(
                dimension_semantics=("parallel", "parallel"),
                vmem_limit_bytes=_VMEM_LIMIT,
            ),
        )(x_c, w_t, g2, be2)
    else:
        # Large Cin: K-tiled matmul with a resident f32 accumulator.
        Cin_p = _round_up(Cin, 128)
        tk = _pick_tile(Cin_p, 128, _MAX_TILE_UNITS)
        # TODO(synk): this pad is an extra HBM pass over x; only taken when
        # Cin > k_panel_cap, where K-tiling is required anyway.
        x_c = jnp.pad(x, ((0, 0), (0, 0), (0, Cin_p - Cin))).astype(operand_dtype)
        w_t = jnp.pad(jnp.transpose(w),
                      ((0, Cin_p - Cin), (0, pad_n))).astype(operand_dtype)
        out_p = pl.pallas_call(
            _fc_ktiled_kernel,
            out_shape=out_shape,
            grid_spec=pltpu.PrefetchScalarGridSpec(
                num_scalar_prefetch=0,
                grid=(B // Bb, n_blocks, Cin_p // tk),
                in_specs=[
                    pl.BlockSpec((Bb, T, tk), lambda bi, ni, ki: (bi, 0, ki)),
                    # If profiling shows exposed weight DMA at small Bb*T, add
                    # pipeline_mode=pl.Buffered(3) here and sweep 2 vs 3.
                    pl.BlockSpec((tk, tn), lambda bi, ni, ki: (ki, ni)),
                    pl.BlockSpec((1, tn), lambda bi, ni, ki: (0, ni)),
                    pl.BlockSpec((1, tn), lambda bi, ni, ki: (0, ni)),
                ],
                out_specs=pl.BlockSpec((Bb, T, tn), lambda bi, ni, ki: (bi, 0, ni)),
                scratch_shapes=[pltpu.VMEM((Bb * T, tn), jnp.float32)],
            ),
            compiler_params=pltpu.CompilerParams(
                dimension_semantics=("parallel", "parallel", "arbitrary"),
                vmem_limit_bytes=_VMEM_LIMIT,
            ),
        )(x_c, w_t, g2, be2)

    # TODO(synk): when Cout is large and not a 128-multiple this slice is an
    # extra HBM pass; a fused consumer should accept the padded width instead.
    return out_p[..., :Cout] if pad_n else out_p


def _reference(x, w, b, gamma, beta):
    """Pure-JAX f32 reference matching the torch module (bias included)."""
    y = jnp.einsum("btc,dc->btd", x, w) + b
    mean = jnp.mean(y, axis=1, keepdims=True)
    var = jnp.mean((y - mean) ** 2, axis=1, keepdims=True)
    y_hat = (y - mean) / jnp.sqrt(var + _EPS)
    y_hat = y_hat * gamma + beta
    return 0.5 * y_hat * (1.0 + jax.lax.erf(y_hat * _INV_SQRT2))


if __name__ == "__main__":
    key = jax.random.PRNGKey(0)

    def _run_case(case_key, B, T, Cin, Cout, tol):
        k_x, k_w, k_b, k_g, k_be = jax.random.split(case_key, 5)
        x = jax.random.normal(k_x, (B, T, Cin), dtype=jnp.float32)
        bound = 1.0 / math.sqrt(Cin)
        w = jax.random.uniform(k_w, (Cout, Cin), jnp.float32, -bound, bound)
        b = jax.random.uniform(k_b, (Cout,), jnp.float32, -bound, bound)
        gamma = 1.0 + 0.1 * jax.random.normal(k_g, (Cout,), jnp.float32)
        beta = 0.1 * jax.random.normal(k_be, (Cout,), jnp.float32)

        out = fc_layer(x, w, b, gamma, beta)
        jax.block_until_ready(out)

        ref = _reference(x, w, b, gamma, beta)
        assert out.shape == (B, T, Cout)
        # bf16 operands => looser tolerance vs the f32 reference (f32 acc/stats).
        assert jnp.allclose(out, ref, atol=tol, rtol=tol), \
            float(jnp.max(jnp.abs(out - ref)))

    k1, k2 = jax.random.split(key)
    # Primary small case (the module's expected (B, T, C) usage).
    _run_case(k1, B=2, T=8, Cin=32, Cout=32, tol=3e-2)
    # Exercises batch blocking (T % 16 == 0) and a lane-dense 128-multiple Cout.
    _run_case(k2, B=4, T=16, Cin=192, Cout=256, tol=3e-2)

    print("KERNEL_OK")
</pallas_src>

<mosaic_0001>
module attributes {stable_mosaic.version = 11 : i64} {
  func.func @_fc_fullk_kernel(%arg0: i32, %arg1: i32, %arg2: memref<1x8x32xbf16, #tpu.memory_space<vmem>>, %arg3: memref<32x32xbf16, #tpu.memory_space<vmem>>, %arg4: memref<1x32xf32, #tpu.memory_space<vmem>>, %arg5: memref<1x32xf32, #tpu.memory_space<vmem>>, %arg6: memref<1x8x32xf32, #tpu.memory_space<vmem>>) attributes {dimension_semantics = [#tpu.dimension_semantics<parallel>, #tpu.dimension_semantics<parallel>], iteration_bounds = array<i64: 2, 1>, scalar_prefetch = 0 : i64, scratch_operands = 0 : i64, tpu.core_type = #tpu.core_type<tc>, window_params = [{transform_indices = @transform_0, window_bounds = array<i64: 1, 8, 32>}, {transform_indices = @transform_1, window_bounds = array<i64: 32, 32>}, {transform_indices = @transform_2, window_bounds = array<i64: 1, 32>}, {transform_indices = @transform_3, window_bounds = array<i64: 1, 32>}, {transform_indices = @transform_4, window_bounds = array<i64: 1, 8, 32>}]} {
    %c0 = arith.constant 0 : index
    %c0_0 = arith.constant 0 : index
    %c0_1 = arith.constant 0 : index
    %0 = vector.load %arg2[%c0, %c0_0, %c0_1] : memref<1x8x32xbf16, #tpu.memory_space<vmem>>, vector<1x8x32xbf16>
    %1 = vector.shape_cast %0 : vector<1x8x32xbf16> to vector<8x32xbf16>
    %c0_2 = arith.constant 0 : index
    %c0_3 = arith.constant 0 : index
    %2 = vector.load %arg3[%c0_2, %c0_3] : memref<32x32xbf16, #tpu.memory_space<vmem>>, vector<32x32xbf16>
    %cst = arith.constant dense<0.000000e+00> : vector<8x32xf32>
    %3 = tpu.matmul %1, %2, %cst {dimension_numbers = #tpu.dot_dimension_numbers<[1], [0], [0], [1], [0, 0, 1, 1], [], []>} : vector<8x32xbf16>, vector<32x32xbf16>, vector<8x32xf32> -> vector<8x32xf32>
    %4 = vector.shape_cast %3 : vector<8x32xf32> to vector<1x8x32xf32>
    %c0_4 = arith.constant 0 : index
    %c0_5 = arith.constant 0 : index
    %5 = vector.load %arg4[%c0_4, %c0_5] : memref<1x32xf32, #tpu.memory_space<vmem>>, vector<1x32xf32>
    %c0_6 = arith.constant 0 : index
    %c0_7 = arith.constant 0 : index
    %6 = vector.load %arg5[%c0_6, %c0_7] : memref<1x32xf32, #tpu.memory_space<vmem>>, vector<1x32xf32>
    %cst_8 = arith.constant dense<0.000000e+00> : vector<1x32xf32>
    %7 = vector.multi_reduction <add>, %4, %cst_8 [1] : vector<1x8x32xf32> to vector<1x32xf32>
    %8 = vector.shape_cast %7 : vector<1x32xf32> to vector<1x1x32xf32>
    %cst_9 = arith.constant 8.000000e+00 : f32
    %9 = vector.broadcast %cst_9 : f32 to vector<1x1x32xf32>
    %10 = arith.divf %8, %9 : vector<1x1x32xf32>
    %11 = vector.broadcast %10 : vector<1x1x32xf32> to vector<1x8x32xf32>
    %12 = arith.subf %4, %11 : vector<1x8x32xf32>
    %13 = vector.broadcast %10 : vector<1x1x32xf32> to vector<1x8x32xf32>
    %14 = arith.subf %4, %13 : vector<1x8x32xf32>
    %15 = arith.mulf %12, %14 : vector<1x8x32xf32>
    %cst_10 = arith.constant dense<0.000000e+00> : vector<1x32xf32>
    %16 = vector.multi_reduction <add>, %15, %cst_10 [1] : vector<1x8x32xf32> to vector<1x32xf32>
    %17 = vector.shape_cast %16 : vector<1x32xf32> to vector<1x1x32xf32>
    %cst_11 = arith.constant 8.000000e+00 : f32
    %18 = vector.broadcast %cst_11 : f32 to vector<1x1x32xf32>
    %19 = arith.divf %17, %18 : vector<1x1x32xf32>
    %cst_12 = arith.constant 9.99999974E-6 : f32
    %20 = vector.broadcast %cst_12 : f32 to vector<1x1x32xf32>
    %21 = arith.addf %19, %20 : vector<1x1x32xf32>
    %22 = math.rsqrt %21 : vector<1x1x32xf32>
    %23 = vector.shape_cast %5 : vector<1x32xf32> to vector<1x1x32xf32>
    %24 = arith.mulf %23, %22 : vector<1x1x32xf32>
    %25 = arith.mulf %10, %24 : vector<1x1x32xf32>
    %26 = vector.shape_cast %6 : vector<1x32xf32> to vector<1x1x32xf32>
    %27 = arith.subf %26, %25 : vector<1x1x32xf32>
    %28 = vector.broadcast %24 : vector<1x1x32xf32> to vector<1x8x32xf32>
    %29 = arith.mulf %4, %28 : vector<1x8x32xf32>
    %30 = vector.broadcast %27 : vector<1x1x32xf32> to vector<1x8x32xf32>
    %31 = arith.addf %29, %30 : vector<1x8x32xf32>
    %cst_13 = arith.constant 5.000000e-01 : f32
    %32 = vector.broadcast %cst_13 : f32 to vector<1x8x32xf32>
    %33 = arith.mulf %32, %31 : vector<1x8x32xf32>
    %cst_14 = arith.constant 0.707106769 : f32
    %34 = vector.broadcast %cst_14 : f32 to vector<1x8x32xf32>
    %35 = arith.mulf %31, %34 : vector<1x8x32xf32>
    %36 = math.erf %35 : vector<1x8x32xf32>
    %cst_15 = arith.constant 1.000000e+00 : f32
    %37 = vector.broadcast %cst_15 : f32 to vector<1x8x32xf32>
    %38 = arith.addf %37, %36 : vector<1x8x32xf32>
    %39 = arith.mulf %33, %38 : vector<1x8x32xf32>
    %c0_16 = arith.constant 0 : index
    %c0_17 = arith.constant 0 : index
    %c0_18 = arith.constant 0 : index
    %40 = vector.load %arg6[%c0_16, %c0_17, %c0_18] : memref<1x8x32xf32, #tpu.memory_space<vmem>>, vector<1x8x32xf32>
    tpu.vector_store %arg6[%c0_16, %c0_17, %c0_18], %39 {strides = array<i32>} : memref<1x8x32xf32, #tpu.memory_space<vmem>>, vector<1x8x32xf32>,
    return
  }
  func.func @transform_0(%arg0: i32, %arg1: i32) -> (i32, i32, i32) {
    %c0_i32 = arith.constant 0 : i32
    %c0_i32_0 = arith.constant 0 : i32
    %c0_i32_1 = arith.constant 0 : i32
    return %arg0, %c0_i32, %c0_i32_0 : i32, i32, i32
  }
  func.func @transform_1(%arg0: i32, %arg1: i32) -> (i32, i32) {
    %c0_i32 = arith.constant 0 : i32
    %c0_i32_0 = arith.constant 0 : i32
    return %c0_i32, %arg1 : i32, i32
  }
  func.func @transform_2(%arg0: i32, %arg1: i32) -> (i32, i32) {
    %c0_i32 = arith.constant 0 : i32
    %c0_i32_0 = arith.constant 0 : i32
    return %c0_i32, %arg1 : i32, i32
  }
  func.func @transform_3(%arg0: i32, %arg1: i32) -> (i32, i32) {
    %c0_i32 = arith.constant 0 : i32
    %c0_i32_0 = arith.constant 0 : i32
    return %c0_i32, %arg1 : i32, i32
  }
  func.func @transform_4(%arg0: i32, %arg1: i32) -> (i32, i32, i32) {
    %c0_i32 = arith.constant 0 : i32
    %c0_i32_0 = arith.constant 0 : i32
    return %arg0, %c0_i32, %arg1 : i32, i32, i32
  }
}

</mosaic_0001>

<bundles_post_ra>
// kernel: fc_layer.1
= control target key start
LH: loop header
LB: loop body
LE: loop exit
PB: predicated region body
PF: predicated region fallthrough
CT: control target
= control target key end

     0   :  { %9 = vsyncpa [#allocation3], 0  ;;  %s794_s0 = inlined_call_operand.vmem [shape: bf16[2,8,32], index: 0, kind: input, shape index: {}]   ;;  %s795_s1 = inlined_call_operand.vmem [shape: bf16[32,32], index: 1, kind: input, shape index: {}]   ;;  %s796_s2 = inlined_call_operand.vmem [shape: f32[1,32], index: 2, kind: input, shape index: {}]   ;;  %s797_s3 = inlined_call_operand.vmem [shape: f32[1,32], index: 3, kind: input, shape index: {}]   ;;  %s798_s4 = inlined_call_operand.hbm [shape: f32[2,8,32], index: 4, kind: output, shape index: {}]  }
   0x1   :  { %11 = vsyncpa [#allocation3 + $0x1], 0  ;;  %s679_s15 = smov 0   ;;  %s681_s16 = smov 0  }
   0x2   :  { %s683_s17 = smov 0   ;;  %s685_s18 = smov 0  }
   0x3   :  { %s687_s19 = smov 0   ;;  %s689_s20 = smov 0  }
   0x4 LB: > { %s482_s21 = sadd.s32 4294967295, %s649_s20   ;;  %s483_s22 = sadd.s32 4294967294, %s649_s20   ;;  %s649_s20 = sphi %s689_s20, %s17_s20   ;;  %s645_s19 = sphi %s687_s19, %s805_s19   ;;  %s641_s18 = sphi %s685_s18, %s804_s18   ;;  %s637_s17 = sphi %s683_s17, %s803_s17   ;;  %s633_s16 = sphi %s681_s16, %s802_s16   ;;  %s629_s15 = sphi %s679_s15, %s801_s15  }
   0x5   : > { %s29_s23 = sadd.s32 1, %s645_s19  ;;  %s142_s24 = sadd.s32 1, %s637_s17 }
   0x6   : > { %p31_p0 = scmp.ge.s32.totalorder %s29_s23, 2  ;;  %p152_p1 = scmp.ne.s32.totalorder %s637_s17, %s633_s16 }
   0x7   : > { %p153_p2 = scmp.eq.s32.totalorder %s482_s21, 1  ;;  %p158_p3 = scmp.ne.s32.totalorder %s633_s16, %s629_s15 }
   0x8   : > { %s807_s23 = smov (%p31_p0, %s29_s23), 0  ;;  %p159_p5 = scmp.eq.s32.totalorder %s483_s22, 1 }
   0x9   : > { %p719_p4 = por %p153_p2, %p152_p1  ;;  %s137_s26 = ssub.s32 %s645_s19, %s807_s23 }
   0xa   : > { %p489_p6 = scmp.ge.s32.totalorder %s649_s20, 1  ;;  %p140_p7 = scmp.eq.s32.totalorder %s137_s26, 0 }
   0xb   : > { %p726_p8 = por %p159_p5, %p158_p3  ;;  %p203_p9 = scmp.lt.s32.totalorder %s649_s20, 3 }
   0xc   : > { %s732_s28 = scalar_select %p140_p7, %s637_s17, %s142_s24  }
   0xd   : > { %p204_p10 = pnand %p489_p6, %p203_p9 }
   0xe   : > { %p238_p11 = scmp.lt.s32.totalorder (!%p204_p10), %s641_s18, 1  ;;  %s235_s22 = sand.u32 (!%p204_p10), 1, %s633_s16  }
   0xf   : > { %207 = sbr.rel (%p204_p10) target bundleno = 315 (0x13b), region = 36  ;;  %s490_s24 = sshll.u32 (!%p204_p10), %s235_s22, 3 }
  0x10   : > { %s496_s26 = sshll.u32 (!%p204_p10), %s641_s18, 7  ;;  %s237_s29 = scalar_lea.vmem (!%p204_p10), [#allocation2], %s490_s24 }
  0x11   : > { %s375_s30 = sshll.u32 (!%p204_p10), %s237_s29, 4  ;;  %s653_s10 = smov (!%p204_p10), [#allocation2]   ;;  %s376_s30 = int_to_ptr.vmem [resolvable:$true] %s375_s30 }
  0x12   : > { %s573_s9 = scalar_lea.vmem (!%p204_p10), %s376_s30, 128 }
  0x13   : > { %p574_p12 = scmp.ne.s32.totalorder (!%p204_p10), %s376_s30, %s573_s9 }
  0x14   : > { %v567_v0 = vld [vmem:[%s795_s1 + $0x8] sm:$0xff]   ;;  %v651_v1 = vmov 0.0   ;;  %v568_v2 = vld [vmem:[%s795_s1] sm:$0xff]   ;;  %vm652_vm0 = vmmov 0   ;;  %s239_s7 = scalar_select %p238_p11, %s641_s18, 1  ;;  %vm270_vm1 = vcmask 261120   ;;  %v341_v27 = vlaneseq }
  0x15   : > { %502 = vmatprep.subr.bf16.mxu0 %v651_v1  ;;  %506 = vmatprep.mubr.msk.bf16.mxu0 %vm652_vm0, %v651_v1  ;;  %v314_v29 = vld [vmem:[%s796_s2] sm:$0x1]  ;;  %p575_p13 = pnand %p574_p12, %p719_p4  ;;  %s577_s18 = sshll.u32 %s653_s10, 4  ;;  %s578_s18 = int_to_ptr.vmem [resolvable:$false] %s577_s18 }
  0x16   : > { %503 = vmatpush3.bf16.msra.mxu0 %v567_v0  ;;  %s491_s8 = sshll.u32 %s239_s7, 2  ;;  %v342_v28 = vshrl.u32 %v341_v27, 7  ;;  %v315_v33 = vld [vmem:[%s797_s3] sm:$0x1]  ;;  %s373_s7 = scalar_lea.hbm %s798_s4, %s496_s26 }
  0x17   : > { %504 = vmatprep.subr.bf16.mxu0 %v651_v1  ;;  %s241_s11 = scalar_lea.vmem %s794_s0, %s491_s8  ;;  %s361_s8 = scalar_lea.sflag [#allocation3], %s235_s22 }
  0x18   : > { %v253_v3 = vld [vmem:[%s241_s11] sm:$0xf]  ;;  %v343_v30 = vsub.s32 0, %v342_v28  ;;  %p576_p0 = pneg %p575_p13  ;;  %s579_s11 = scalar_lea.vmem %s578_s18, 256 }
  0x19   : > { %p580_p1 = scmp.lt.s32.totalorder %s376_s30, %s578_s18  ;;  %p581_p2 = scmp.lt.s32.totalorder %s579_s11, %s573_s9 }
  0x1a   : > { %505 = vmatpush3.bf16.msra.mxu0 %v568_v2 }
  0x1b   : > { %p582_p3 = por %p581_p2, %p580_p1 }
  0x1d   : > { %507 = vmatmul.mubr.msk.bf16.vlgmr.msra.gmra.mxu0 %vm270_vm1, %v253_v3  ;;  %p583_p5 = pnand %p582_p3, %p576_p0 }
  0xdd   : > { %v308_v4 = vpop.f32.mrf.mxu0 }
  0xde   : > { %v316_v5 = vsel %vm270_vm1, %v308_v4, 0.0 }
  0xdf   : > { %v317_v6 = vrot.slane %v316_v5, 4  ;;  %v508_v7 = vpop.f32.mrf.mxu0 }
  0xe1   : > { %v318_v8 = vadd.f32 %v317_v6, %v316_v5  ;;  %v311_v9 = vpop.f32.mrf.mxu0 }
  0xe3   : > { %v319_v10 = vrot.slane %v318_v8, 2  ;;  %v509_v11 = vpop.f32.mrf.mxu0 }
  0xe5   : > { %v320_v12 = vadd.f32 %v319_v10, %v318_v8 }
  0xe7   : > { %v321_v13 = vrot.slane %v320_v12, 1 }
  0xe9   : > { %v322_v14 = vadd.f32 %v321_v13, %v320_v12 }
  0xeb   : > { %v324_v15 = vmul.f32 0.125, %v322_v14 }
  0xed   : > { %v325_v16 = vsub.f32 %v308_v4, %v324_v15 }
  0xef   : > { %v326_v17 = vmul.f32 %v325_v16, %v325_v16 }
  0xf1   : > { %v327_v18 = vsel %vm270_vm1, %v326_v17, 0.0 }
  0xf2   : > { %v328_v19 = vrot.slane %v327_v18, 4 }
  0xf4   : > { %v329_v20 = vadd.f32 %v328_v19, %v327_v18 }
  0xf6   : > { %v330_v21 = vrot.slane %v329_v20, 2 }
  0xf8   : > { %v331_v22 = vadd.f32 %v330_v21, %v329_v20 }
  0xfa   : > { %v332_v23 = vrot.slane %v331_v22, 1 }
  0xfc   : > { %v333_v24 = vadd.f32 %v332_v23, %v331_v22 }
  0xfe   : > { %v334_v25 = vmul.f32 0.125, %v333_v24 }
 0x100   : > { %v335_v26 = vadd.f32 1e-05, %v334_v25 }
 0x102   : > { %569 = vrsqrt.f32 %v335_v26 }
 0x10f   : > { %v570_v31 = vpop.eup %569 }
 0x110   : > { %v337_v32 = vmul.f32 %v570_v31, %v314_v29 }
 0x112   : > { %v338_v34 = vmul.f32 %v337_v32, %v324_v15  ;;  %v344_v35 = vrot.slane %v337_v32, %v343_v30 }
 0x114   : > { %v339_v36 = vsub.f32 %v315_v33, %v338_v34  ;;  %v346_v37 = vmul.f32 %v344_v35, %v308_v4 }
 0x116   : > { %v351_v38 = vrot.slane %v339_v36, %v343_v30 }
 0x118   : > { %v353_v39 = vadd.f32 %v351_v38, %v346_v37 }
 0x11a   : > { %v355_v40 = vmul.f32 0.70710677, %v353_v39  ;;  %v354_v42 = vmul.f32 0.5, %v353_v39 }
 0x11c   : > { %571 = verf.f32 %v355_v40 }
 0x129   : > { %v572_v41 = vpop.eup %571 }
 0x12a   : > { %v357_v43 = vadd.f32 1.0, %v572_v41 }
 0x12c   : > { %v358_v44 = vmul.f32 %v357_v43, %v354_v42 }
 0x12e   : > { %359 = vst.msk [vmem:[%s237_s29] sm:$0xff] %vm270_vm1, %v358_v44 }
 0x12f   : > { %586 = shalt.err (!%p583_p5)
}
 0x130   : > { %s587_s12 = scalar_lea.hbm %s373_s7, 128  ;;  %s591_s21 = scalar_lea.hbm %s798_s4, 256 }
 0x131   : > { %p588_p6 = scmp.ne.s32.totalorder %s373_s7, %s587_s12  ;;  %p592_p10 = scmp.lt.s32.totalorder %s373_s7, %s798_s4 }
 0x132   : > { %p593_p11 = scmp.lt.s32.totalorder %s591_s21, %s587_s12 }
 0x133   : > { %p589_p7 = pnand %p588_p6, %p719_p4 }
 0x134   : > { %p594_p12 = por %p593_p11, %p592_p10 }
 0x135   : > { %p590_p9 = pneg %p589_p7 }
 0x137   : > { %p595_p13 = pnand %p594_p12, %p590_p9 }
 0x139   : > { %598 = shalt.err (!%p595_p13)
}
 0x13a   : > { %510 = dma.vmem_to_hbm [thread:$0]  (%p719_p4), %s376_s30, 128, %s373_s7, %s361_s8  }
 0x13b PF: > { %p516_p0 = scmp.ge.s32.totalorder %s649_s20, 2  ;;  %s387_s26 = sand.u32 1, %s629_s15  }
 0x13c   : > { %s388_s29 = scalar_lea.sflag [#allocation3], %s387_s26 }
 0x13d   : > { %p513_p1 = pnand %p516_p0, %p726_p8 }
 0x13f   : > { %p514_p2 = pneg %p513_p1 }
 0x141   : > { %624 = dma.done.wait (%p514_p2), %s388_s29, 128  }
 0x142   : > { %626 = vsyncadd (%p514_p2), %s388_s29, 4294967168  ;;  %s17_s20 = sadd.s32 1, %s649_s20   ;;  %s801_s15 = smov %s633_s16 }
 0x143   : > { %p14_p3 = scmp.ge.s32.totalorder %s17_s20, 4   ;;  %s802_s16 = smov %s637_s17 }
 0x144   : > { %s803_s17 = smov %s732_s28  ;;  %s804_s18 = smov %s645_s19 }
 0x145   : > { %s805_s19 = smov %s807_s23  ;;  %16 = sbr.rel (!%p14_p3) target bundleno = 4 (0x4), region = 80 }
 0x14a   :  { %393 = vsyncpa [#allocation3], 1 }
 0x14b   :  { %395 = vsyncpa [#allocation3 + $0x1], 1 }

</bundles_post_ra>
